<compile_context>
chip_gen: v7x
topology: tpu7x:2x2x1
jax: 0.10.0
libtpu: 0.0.40
codegen_flags: <defaults>
</compile_context>

<pallas_src>
from math import floor

import jax
import jax.numpy as jnp
from jax.experimental import pallas as pl
from jax.experimental.pallas import tpu as pltpu

BN_EPS = 1e-5
CONV_OUT = 128    # seqCNN1D_outChannels
CONV_K = 2        # seqCNN1D_kernelSize
POOL = 2          # seqCNN1D_poolingRate
FC1 = 128
FC2 = 128


def _round_up(n, m):
    return ((n + m - 1) // m) * m


def dgaze_fused_kernel(x_ref, wce_ref, wco_ref, cb_ref, w1_ref, b1_ref,
                       w2_ref, b2_ref, w3_ref, b3_ref, out_ref):
    """Fused Conv1d+BN+ReLU+MaxPool -> FC+BN+ReLU -> FC+BN+ReLU -> FC.

    x_ref   : (bb, L*F)            flattened sequence, (t, c) row-major
    wce_ref : (L*F, pool_len*128)  BN-folded banded conv weight, even positions
    wco_ref : (L*F, pool_len*128)  same for odd conv positions
    cb_ref  : (1, pool_len*128)    BN-folded conv bias, tiled per pool block (f32)
    w1_ref  : (pool_len*128, 128)  FC1 weight, rows permuted to pool-major order
    w2_ref  : (128, 128),  w3_ref : (128, out_pad)  (zero-padded columns)
    biases  : (1, width)           f32 (BN folded)
    """
    x = x_ref[...]

    # Conv at all even / odd positions: two banded, lane-aligned matmuls.
    conv_e = jnp.dot(x, wce_ref[...], preferred_element_type=jnp.float32)
    conv_o = jnp.dot(x, wco_ref[...], preferred_element_type=jnp.float32)

    # MaxPool1d(2) = max(even, odd); bias + ReLU applied once after the pool
    # (max(a+b, c+b) = max(a,c)+b and relu(max(a,c)) = max(relu a, relu c)).
    act = jnp.maximum(jnp.maximum(conv_e, conv_o) + cb_ref[...], 0.0)

    # FC1 as a single matmul: act is pool-major and w1 rows were permuted at
    # init, so the PyTorch channel-major flatten never materializes and the
    # MXU accumulates along K internally.
    h1 = jnp.dot(act.astype(w1_ref.dtype), w1_ref[...],
                 preferred_element_type=jnp.float32) + b1_ref[...]
    h1 = jnp.maximum(h1, 0.0)

    h2 = jnp.dot(h1.astype(w2_ref.dtype), w2_ref[...],
                 preferred_element_type=jnp.float32) + b2_ref[...]
    h2 = jnp.maximum(h2, 0.0)

    out_ref[...] = (jnp.dot(h2.astype(w3_ref.dtype), w3_ref[...],
                            preferred_element_type=jnp.float32)
                    + b3_ref[...]).astype(out_ref.dtype)


def _bn_params(key, n, bias_scale=0.1):
    """Deterministic raw params: (bias, (gamma, beta, running_mean, running_var))."""
    k0, k1, k2, k3, k4 = jax.random.split(key, 5)
    bias = bias_scale * jax.random.normal(k0, (n,), jnp.float32)
    gamma = jax.random.uniform(k1, (n,), jnp.float32, 0.8, 1.2)
    beta = 0.1 * jax.random.normal(k2, (n,), jnp.float32)
    mean = 0.1 * jax.random.normal(k3, (n,), jnp.float32)
    var = jax.random.uniform(k4, (n,), jnp.float32, 0.5, 1.5)
    return bias, (gamma, beta, mean, var)


class DGazeHeadObjectPallas:
    def __init__(self, seqLength, seqFeatureNum, n_output, dropoutRate, key,
                 matmul_dtype=jnp.bfloat16):
        self.seqLength = seqLength
        self.seqFeatureNum = seqFeatureNum
        self.n_output = n_output
        self.dropoutRate = dropoutRate  # identity in eval mode
        self.matmul_dtype = matmul_dtype
        self.seqSize = seqLength * seqFeatureNum
        self.conv_len = seqLength - CONV_K + 1
        self.pool_len = floor(self.conv_len / POOL)
        assert self.pool_len >= 1, "seqLength too short"
        self.seqCNN1D_outputSize = self.pool_len * CONV_OUT
        self.out_pad = max(128, _round_up(n_output, 128))

        keys = jax.random.split(key, 8)

        # ---- raw (PyTorch-layout) parameters, kept for the pure-JAX reference
        self.w_conv_raw = 0.2 * jax.random.normal(
            keys[0], (CONV_OUT, seqFeatureNum, CONV_K), jnp.float32)   # (O, F, K)
        self.b_conv_raw, self.bn_c = _bn_params(keys[1], CONV_OUT)
        self.w1_raw = 0.1 * jax.random.normal(
            keys[2], (self.seqCNN1D_outputSize, FC1), jnp.float32)     # (in, out)
        self.b1_raw, self.bn1 = _bn_params(keys[3], FC1)
        self.w2_raw = 0.1 * jax.random.normal(keys[4], (FC1, FC2), jnp.float32)
        self.b2_raw, self.bn2 = _bn_params(keys[5], FC2)
        self.w3_raw = 0.1 * jax.random.normal(keys[6], (FC2, n_output), jnp.float32)
        self.b3_raw = 0.1 * jax.random.normal(keys[7], (n_output,), jnp.float32)

        # ---- fold eval-mode BatchNorm into weights/biases (once, host-side)
        def fold(w, b, bn):
            gamma, beta, mean, var = bn
            scale = gamma * jax.lax.rsqrt(var + BN_EPS)
            return w * scale[None, :], ((b - mean) * scale + beta)[None, :]

        # Conv weight in matmul layout: row index = k*F + c  ->  (K*F, O)
        wc_mat = jnp.transpose(self.w_conv_raw, (2, 1, 0)).reshape(
            CONV_K * seqFeatureNum, CONV_OUT)
        wc_fold, cb_fold = fold(wc_mat, self.b_conv_raw, self.bn_c)

        # Block-banded conv weights: column block p carries conv position
        # 2p (even) / 2p+1 (odd); rows t*F .. (t+2)*F-1 hold the folded kernel.
        band_cols = self.pool_len * CONV_OUT
        F = seqFeatureNum
        wce = jnp.zeros((self.seqSize, band_cols), jnp.float32)
        wco = jnp.zeros((self.seqSize, band_cols), jnp.float32)
        for p in range(self.pool_len):
            te, to = 2 * p, 2 * p + 1
            wce = wce.at[te * F:(te + 2) * F,
                         p * CONV_OUT:(p + 1) * CONV_OUT].set(wc_fold)
            wco = wco.at[to * F:(to + 2) * F,
                         p * CONV_OUT:(p + 1) * CONV_OUT].set(wc_fold)
        self.wce = wce.astype(matmul_dtype)
        self.wco = wco.astype(matmul_dtype)
        self.cb_tiled = jnp.tile(cb_fold, (1, self.pool_len))        # (1, P*128) f32

        w1_fold, self.b1_fold = fold(self.w1_raw, self.b1_raw, self.bn1)
        # Permute FC1 input rows from channel-major (o*pool_len + p) to
        # pool-major (p*128 + o) so FC1 is one stacked-K matmul.
        self.w1_perm = jnp.transpose(
            w1_fold.reshape(CONV_OUT, self.pool_len, FC1), (1, 0, 2)
        ).reshape(self.pool_len * CONV_OUT, FC1).astype(matmul_dtype)

        w2_fold, self.b2_fold = fold(self.w2_raw, self.b2_raw, self.bn2)
        self.w2_fold = w2_fold.astype(matmul_dtype)

        # Lane-dense final layer: pad output columns to a multiple of 128.
        self.w3_pad = jnp.zeros((FC2, self.out_pad), jnp.float32
                                ).at[:, :n_output].set(self.w3_raw
                                ).astype(matmul_dtype)
        self.b3_pad = jnp.zeros((1, self.out_pad), jnp.float32
                                ).at[0, :n_output].set(self.b3_raw)

    def __call__(self, x):
        B = x.shape[0]
        xseq = x[:, : self.seqSize].astype(self.matmul_dtype)  # (B, L*F)

        # Batch blocking: bb <= 128 bounds pad waste to <128 rows and gives
        # >=2 "parallel" blocks (v7x megacore) once B > 128.
        bb = min(128, _round_up(max(B, 1), 8))
        Bp = _round_up(B, bb)
        if Bp != B:
            xseq = jnp.pad(xseq, ((0, Bp - B), (0, 0)))

        full = pl.pallas_call(
            dgaze_fused_kernel,
            out_shape=jax.ShapeDtypeStruct((Bp, self.out_pad), jnp.float32),
            grid=(Bp // bb,),
            in_specs=[
                pl.BlockSpec((bb, self.seqSize), lambda i: (i, 0)),
                pl.BlockSpec(self.wce.shape, lambda i: (0, 0)),
                pl.BlockSpec(self.wco.shape, lambda i: (0, 0)),
                pl.BlockSpec(self.cb_tiled.shape, lambda i: (0, 0)),
                pl.BlockSpec(self.w1_perm.shape, lambda i: (0, 0)),
                pl.BlockSpec(self.b1_fold.shape, lambda i: (0, 0)),
                pl.BlockSpec(self.w2_fold.shape, lambda i: (0, 0)),
                pl.BlockSpec(self.b2_fold.shape, lambda i: (0, 0)),
                pl.BlockSpec(self.w3_pad.shape, lambda i: (0, 0)),
                pl.BlockSpec(self.b3_pad.shape, lambda i: (0, 0)),
            ],
            out_specs=pl.BlockSpec((bb, self.out_pad), lambda i: (i, 0)),
            compiler_params=pltpu.CompilerParams(
                dimension_semantics=("parallel",)),
        )(xseq, self.wce, self.wco, self.cb_tiled, self.w1_perm, self.b1_fold,
          self.w2_fold, self.b2_fold, self.w3_pad, self.b3_pad)

        return full[:B, : self.n_output]

    # ---- pure-JAX reference (raw, un-folded params; mirrors PyTorch exactly)
    def reference(self, x):
        B = x.shape[0]
        xr = x[:, : self.seqSize].reshape(B, self.seqLength, self.seqFeatureNum)
        xp = jnp.transpose(xr, (0, 2, 1))                     # (B, F, L) == NCW

        conv = jnp.zeros((B, CONV_OUT, self.conv_len), jnp.float32)
        for k in range(CONV_K):
            conv = conv + jnp.einsum(
                "bfl,of->bol", xp[:, :, k:k + self.conv_len],
                self.w_conv_raw[:, :, k], precision="highest")
        conv = conv + self.b_conv_raw[None, :, None]
        g, bta, mu, var = self.bn_c
        conv = ((conv - mu[None, :, None])
                * (g * jax.lax.rsqrt(var + BN_EPS))[None, :, None]
                + bta[None, :, None])
        conv = jnp.maximum(conv, 0.0)
        pooled = jnp.max(
            conv[:, :, : self.pool_len * POOL].reshape(
                B, CONV_OUT, self.pool_len, POOL), axis=-1)
        feat = pooled.reshape(B, self.seqCNN1D_outputSize)    # channel-major flatten

        def fc_bn_relu(h, w, b, bn):
            gg, bb_, m, v = bn
            y = jnp.dot(h, w, precision="highest") + b
            y = (y - m) * (gg * jax.lax.rsqrt(v + BN_EPS)) + bb_
            return jnp.maximum(y, 0.0)

        h1 = fc_bn_relu(feat, self.w1_raw, self.b1_raw, self.bn1)
        h2 = fc_bn_relu(h1, self.w2_raw, self.b2_raw, self.bn2)
        return jnp.dot(h2, self.w3_raw, precision="highest") + self.b3_raw


if __name__ == "__main__":
    seqLength = 8
    seqFeatureNum = 6
    n_output = 2
    dropoutRate = 0.5
    batch = 4

    key = jax.random.PRNGKey(0)
    k_model, k_x = jax.random.split(key)
    x = jax.random.normal(k_x, (batch, seqLength * seqFeatureNum), jnp.float32)

    # f32-operand mode: tight check that the fused layout/algebra is exact.
    model_f32 = DGazeHeadObjectPallas(seqLength, seqFeatureNum, n_output,
                                      dropoutRate, k_model,
                                      matmul_dtype=jnp.float32)
    out_f32 = jax.block_until_ready(model_f32(x))
    assert out_f32.shape == (batch, n_output), out_f32.shape
    ref = jax.block_until_ready(model_f32.reference(x))
    diff_f32 = float(jnp.max(jnp.abs(out_f32 - ref)))
    assert diff_f32 < 1e-3, f"f32 kernel mismatch vs reference: {diff_f32}"

    # bf16-operand mode (deployment default: feeds the bf16-native MXU on
    # v5e/v6e/v7x; elementwise math stays f32).  Looser tolerance accounts for
    # bf16 operand rounding only.
    model_bf16 = DGazeHeadObjectPallas(seqLength, seqFeatureNum, n_output,
                                       dropoutRate, k_model,
                                       matmul_dtype=jnp.bfloat16)
    out_bf16 = jax.block_until_ready(model_bf16(x))
    assert out_bf16.shape == (batch, n_output), out_bf16.shape
    diff_bf16 = float(jnp.max(jnp.abs(out_bf16 - ref)))
    assert diff_bf16 < 1e-1, f"bf16 kernel mismatch vs reference: {diff_bf16}"

    print("KERNEL_OK")
</pallas_src>

<mosaic_0001>
module attributes {stable_mosaic.version = 11 : i64} {
  func.func @dgaze_fused_kernel(%arg0: i32, %arg1: memref<8x48xf32, #tpu.memory_space<vmem>>, %arg2: memref<48x384xf32, #tpu.memory_space<vmem>>, %arg3: memref<48x384xf32, #tpu.memory_space<vmem>>, %arg4: memref<1x384xf32, #tpu.memory_space<vmem>>, %arg5: memref<384x128xf32, #tpu.memory_space<vmem>>, %arg6: memref<1x128xf32, #tpu.memory_space<vmem>>, %arg7: memref<128x128xf32, #tpu.memory_space<vmem>>, %arg8: memref<1x128xf32, #tpu.memory_space<vmem>>, %arg9: memref<128x128xf32, #tpu.memory_space<vmem>>, %arg10: memref<1x128xf32, #tpu.memory_space<vmem>>, %arg11: memref<8x128xf32, #tpu.memory_space<vmem>>) attributes {dimension_semantics = [#tpu.dimension_semantics<parallel>], iteration_bounds = array<i64: 1>, scalar_prefetch = 0 : i64, scratch_operands = 0 : i64, tpu.core_type = #tpu.core_type<tc>, window_params = [{transform_indices = @transform_0, window_bounds = array<i64: 8, 48>}, {pipeline_mode = #tpu.pipeline_mode<synchronous>, transform_indices = @transform_1, window_bounds = array<i64: 48, 384>}, {pipeline_mode = #tpu.pipeline_mode<synchronous>, transform_indices = @transform_2, window_bounds = array<i64: 48, 384>}, {pipeline_mode = #tpu.pipeline_mode<synchronous>, transform_indices = @transform_3, window_bounds = array<i64: 1, 384>}, {pipeline_mode = #tpu.pipeline_mode<synchronous>, transform_indices = @transform_4, window_bounds = array<i64: 384, 128>}, {pipeline_mode = #tpu.pipeline_mode<synchronous>, transform_indices = @transform_5, window_bounds = array<i64: 1, 128>}, {pipeline_mode = #tpu.pipeline_mode<synchronous>, transform_indices = @transform_6, window_bounds = array<i64: 128, 128>}, {pipeline_mode = #tpu.pipeline_mode<synchronous>, transform_indices = @transform_7, window_bounds = array<i64: 1, 128>}, {pipeline_mode = #tpu.pipeline_mode<synchronous>, transform_indices = @transform_8, window_bounds = array<i64: 128, 128>}, {pipeline_mode = #tpu.pipeline_mode<synchronous>, transform_indices = @transform_9, window_bounds = array<i64: 1, 128>}, {transform_indices = @transform_10, window_bounds = array<i64: 8, 128>}]} {
    %c0 = arith.constant 0 : index
    %c0_0 = arith.constant 0 : index
    %0 = vector.load %arg1[%c0, %c0_0] : memref<8x48xf32, #tpu.memory_space<vmem>>, vector<8x48xf32>
    %c0_1 = arith.constant 0 : index
    %c0_2 = arith.constant 0 : index
    %1 = vector.load %arg2[%c0_1, %c0_2] : memref<48x384xf32, #tpu.memory_space<vmem>>, vector<48x384xf32>
    %cst = arith.constant dense<0.000000e+00> : vector<8x384xf32>
    %2 = tpu.matmul %0, %1, %cst {dimension_numbers = #tpu.dot_dimension_numbers<[1], [0], [0], [1], [0, 0, 1, 1], [], []>} : vector<8x48xf32>, vector<48x384xf32>, vector<8x384xf32> -> vector<8x384xf32>
    %c0_3 = arith.constant 0 : index
    %c0_4 = arith.constant 0 : index
    %3 = vector.load %arg3[%c0_3, %c0_4] : memref<48x384xf32, #tpu.memory_space<vmem>>, vector<48x384xf32>
    %cst_5 = arith.constant dense<0.000000e+00> : vector<8x384xf32>
    %4 = tpu.matmul %0, %3, %cst_5 {dimension_numbers = #tpu.dot_dimension_numbers<[1], [0], [0], [1], [0, 0, 1, 1], [], []>} : vector<8x48xf32>, vector<48x384xf32>, vector<8x384xf32> -> vector<8x384xf32>
    %5 = arith.maximumf %2, %4 : vector<8x384xf32>
    %c0_6 = arith.constant 0 : index
    %c0_7 = arith.constant 0 : index
    %6 = vector.load %arg4[%c0_6, %c0_7] : memref<1x384xf32, #tpu.memory_space<vmem>>, vector<1x384xf32>
    %7 = vector.broadcast %6 : vector<1x384xf32> to vector<8x384xf32>
    %8 = arith.addf %5, %7 : vector<8x384xf32>
    %cst_8 = arith.constant 0.000000e+00 : f32
    %9 = vector.broadcast %cst_8 : f32 to vector<8x384xf32>
    %10 = arith.maximumf %8, %9 : vector<8x384xf32>
    %c0_9 = arith.constant 0 : index
    %c0_10 = arith.constant 0 : index
    %11 = vector.load %arg5[%c0_9, %c0_10] : memref<384x128xf32, #tpu.memory_space<vmem>>, vector<384x128xf32>
    %cst_11 = arith.constant dense<0.000000e+00> : vector<8x128xf32>
    %12 = tpu.matmul %10, %11, %cst_11 {dimension_numbers = #tpu.dot_dimension_numbers<[1], [0], [0], [1], [0, 0, 1, 1], [], []>} : vector<8x384xf32>, vector<384x128xf32>, vector<8x128xf32> -> vector<8x128xf32>
    %c0_12 = arith.constant 0 : index
    %c0_13 = arith.constant 0 : index
    %13 = vector.load %arg6[%c0_12, %c0_13] : memref<1x128xf32, #tpu.memory_space<vmem>>, vector<1x128xf32>
    %14 = vector.broadcast %13 : vector<1x128xf32> to vector<8x128xf32>
    %15 = arith.addf %12, %14 : vector<8x128xf32>
    %cst_14 = arith.constant 0.000000e+00 : f32
    %16 = vector.broadcast %cst_14 : f32 to vector<8x128xf32>
    %17 = arith.maximumf %15, %16 : vector<8x128xf32>
    %c0_15 = arith.constant 0 : index
    %c0_16 = arith.constant 0 : index
    %18 = vector.load %arg7[%c0_15, %c0_16] : memref<128x128xf32, #tpu.memory_space<vmem>>, vector<128x128xf32>
    %cst_17 = arith.constant dense<0.000000e+00> : vector<8x128xf32>
    %19 = tpu.matmul %17, %18, %cst_17 {dimension_numbers = #tpu.dot_dimension_numbers<[1], [0], [0], [1], [0, 0, 1, 1], [], []>} : vector<8x128xf32>, vector<128x128xf32>, vector<8x128xf32> -> vector<8x128xf32>
    %c0_18 = arith.constant 0 : index
    %c0_19 = arith.constant 0 : index
    %20 = vector.load %arg8[%c0_18, %c0_19] : memref<1x128xf32, #tpu.memory_space<vmem>>, vector<1x128xf32>
    %21 = vector.broadcast %20 : vector<1x128xf32> to vector<8x128xf32>
    %22 = arith.addf %19, %21 : vector<8x128xf32>
    %cst_20 = arith.constant 0.000000e+00 : f32
    %23 = vector.broadcast %cst_20 : f32 to vector<8x128xf32>
    %24 = arith.maximumf %22, %23 : vector<8x128xf32>
    %c0_21 = arith.constant 0 : index
    %c0_22 = arith.constant 0 : index
    %25 = vector.load %arg9[%c0_21, %c0_22] : memref<128x128xf32, #tpu.memory_space<vmem>>, vector<128x128xf32>
    %cst_23 = arith.constant dense<0.000000e+00> : vector<8x128xf32>
    %26 = tpu.matmul %24, %25, %cst_23 {dimension_numbers = #tpu.dot_dimension_numbers<[1], [0], [0], [1], [0, 0, 1, 1], [], []>} : vector<8x128xf32>, vector<128x128xf32>, vector<8x128xf32> -> vector<8x128xf32>
    %c0_24 = arith.constant 0 : index
    %c0_25 = arith.constant 0 : index
    %27 = vector.load %arg10[%c0_24, %c0_25] : memref<1x128xf32, #tpu.memory_space<vmem>>, vector<1x128xf32>
    %28 = vector.broadcast %27 : vector<1x128xf32> to vector<8x128xf32>
    %29 = arith.addf %26, %28 : vector<8x128xf32>
    %c0_26 = arith.constant 0 : index
    %c0_27 = arith.constant 0 : index
    %30 = vector.load %arg11[%c0_26, %c0_27] : memref<8x128xf32, #tpu.memory_space<vmem>>, vector<8x128xf32>
    tpu.vector_store %arg11[%c0_26, %c0_27], %29 {strides = array<i32>} : memref<8x128xf32, #tpu.memory_space<vmem>>, vector<8x128xf32>,
    return
  }
  func.func @transform_0(%arg0: i32) -> (i32, i32) {
    %c0_i32 = arith.constant 0 : i32
    %c0_i32_0 = arith.constant 0 : i32
    return %arg0, %c0_i32 : i32, i32
  }
  func.func @transform_1(%arg0: i32) -> (i32, i32) {
    %c0_i32 = arith.constant 0 : i32
    %c0_i32_0 = arith.constant 0 : i32
    %c0_i32_1 = arith.constant 0 : i32
    return %c0_i32, %c0_i32_0 : i32, i32
  }
  func.func @transform_2(%arg0: i32) -> (i32, i32) {
    %c0_i32 = arith.constant 0 : i32
    %c0_i32_0 = arith.constant 0 : i32
    %c0_i32_1 = arith.constant 0 : i32
    return %c0_i32, %c0_i32_0 : i32, i32
  }
  func.func @transform_3(%arg0: i32) -> (i32, i32) {
    %c0_i32 = arith.constant 0 : i32
    %c0_i32_0 = arith.constant 0 : i32
    %c0_i32_1 = arith.constant 0 : i32
    return %c0_i32, %c0_i32_0 : i32, i32
  }
  func.func @transform_4(%arg0: i32) -> (i32, i32) {
    %c0_i32 = arith.constant 0 : i32
    %c0_i32_0 = arith.constant 0 : i32
    %c0_i32_1 = arith.constant 0 : i32
    return %c0_i32, %c0_i32_0 : i32, i32
  }
  func.func @transform_5(%arg0: i32) -> (i32, i32) {
    %c0_i32 = arith.constant 0 : i32
    %c0_i32_0 = arith.constant 0 : i32
    %c0_i32_1 = arith.constant 0 : i32
    return %c0_i32, %c0_i32_0 : i32, i32
  }
  func.func @transform_6(%arg0: i32) -> (i32, i32) {
    %c0_i32 = arith.constant 0 : i32
    %c0_i32_0 = arith.constant 0 : i32
    %c0_i32_1 = arith.constant 0 : i32
    return %c0_i32, %c0_i32_0 : i32, i32
  }
  func.func @transform_7(%arg0: i32) -> (i32, i32) {
    %c0_i32 = arith.constant 0 : i32
    %c0_i32_0 = arith.constant 0 : i32
    %c0_i32_1 = arith.constant 0 : i32
    return %c0_i32, %c0_i32_0 : i32, i32
  }
  func.func @transform_8(%arg0: i32) -> (i32, i32) {
    %c0_i32 = arith.constant 0 : i32
    %c0_i32_0 = arith.constant 0 : i32
    %c0_i32_1 = arith.constant 0 : i32
    return %c0_i32, %c0_i32_0 : i32, i32
  }
  func.func @transform_9(%arg0: i32) -> (i32, i32) {
    %c0_i32 = arith.constant 0 : i32
    %c0_i32_0 = arith.constant 0 : i32
    %c0_i32_1 = arith.constant 0 : i32
    return %c0_i32, %c0_i32_0 : i32, i32
  }
  func.func @transform_10(%arg0: i32) -> (i32, i32) {
    %c0_i32 = arith.constant 0 : i32
    %c0_i32_0 = arith.constant 0 : i32
    return %arg0, %c0_i32 : i32, i32
  }
}

</mosaic_0001>

<bundles_post_ra>
// kernel: tpu_custom_call.1
= control target key start
LH: loop header
LB: loop body
LE: loop exit
PB: predicated region body
PF: predicated region fallthrough
CT: control target
= control target key end

     0   :  { %15 = vsyncpa [#allocation3], 0  ;;  %s1673_s0 = inlined_call_operand.hbm [shape: f32[8,48], index: 0, kind: input, shape index: {}]   ;;  %s1674_s1 = inlined_call_operand.hbm [shape: f32[48,384], index: 1, kind: input, shape index: {}]   ;;  %s1675_s2 = inlined_call_operand.hbm [shape: f32[48,384], index: 2, kind: input, shape index: {}]   ;;  %s1676_s3 = inlined_call_operand.vmem [shape: f32[1,384], index: 3, kind: input, shape index: {}]   ;;  %s1677_s4 = inlined_call_operand.hbm [shape: f32[384,128], index: 4, kind: input, shape index: {}]   ;;  %s1678_s5 = inlined_call_operand.vmem [shape: f32[1,128], index: 5, kind: input, shape index: {}]   ;;  %s1679_s6 = inlined_call_operand.hbm [shape: f32[128,128], index: 6, kind: input, shape index: {}]   ;;  %s1680_s7 = inlined_call_operand.vmem [shape: f32[1,128], index: 7, kind: input, shape index: {}]   ;;  %s1681_s8 = inlined_call_operand.hbm [shape: f32[128,128], index: 8, kind: input, shape index: {}]   ;;  %s1682_s9 = inlined_call_operand.vmem [shape: f32[1,128], index: 9, kind: input, shape index: {}]   ;;  %s1683_s10 = inlined_call_operand.hbm [shape: f32[8,128], index: 10, kind: output, shape index: {}]  }
   0x1   :  { %16 = vsyncpa [#allocation6], 0 }
   0x2   :  { %17 = vsyncpa [#allocation9], 0 }
   0x3   :  { %18 = vsyncpa [#allocation12], 0 }
   0x4   :  { %19 = vsyncpa [#allocation4], 0  ;;  %s1433_s13 = smov [#allocation5]   ;;  %s1269_s17 = scalar_lea.hbm %s1674_s1, 2304 }
   0x5   :  { %s35_s14 = sshll.u32 %s1433_s13, 4  ;;  %p1270_p0 = scmp.ne.s32.totalorder %s1674_s1, %s1269_s17  ;;  %s36_s14 = int_to_ptr.vmem [resolvable:$true] %s35_s14 }
   0x6   :  { %p1273_p1 = scmp.lt.u32.totalorder %s1269_s17, %s1674_s1 }
   0x8   :  { %p1275_p2 = pnand %p1273_p1, %p1270_p0 }
   0xa   :  { %1278 = shalt.err (!%p1275_p2)
}
   0xb   :  { %s1279_s22 = scalar_lea.vmem %s36_s14, 2304  ;;  %p1284_p4 = scmp.lt.s32.totalorder %s36_s14, %s36_s14 }
   0xc   :  { %p1280_p3 = scmp.ne.s32.totalorder %s36_s14, %s1279_s22  ;;  %p1285_p5 = scmp.lt.s32.totalorder %s1279_s22, %s1279_s22 }
   0xe   :  { %p1286_p6 = por %p1285_p5, %p1284_p4 }
  0x10   :  { %p1287_p7 = pnand %p1286_p6, %p1280_p3 }
  0x12   :  { %1290 = shalt.err (!%p1287_p7)
}
  0x13   :  { %s1434_s23 = smov 384   ;;  %s1435_s24 = smov 24  }
  0x14   :  { %41 = dma.hbm_to_vmem [thread:$0]  %s1674_s1, 2304, %s36_s14, [#allocation6], %s1434_s23, %s1434_s23, %s1435_s24  }
  0x15   :  { %s1436_s27 = smov [#allocation8]   ;;  %s1291_s11 = scalar_lea.hbm %s1677_s4, 6144 }
  0x16   :  { %s61_s28 = sshll.u32 %s1436_s27, 4  ;;  %p1292_p8 = scmp.ne.s32.totalorder %s1677_s4, %s1291_s11  ;;  %s62_s28 = int_to_ptr.vmem [resolvable:$true] %s61_s28 }
  0x17   :  { %p1295_p9 = scmp.lt.u32.totalorder %s1291_s11, %s1677_s4 }
  0x19   :  { %p1297_p10 = pnand %p1295_p9, %p1292_p8 }
  0x1b   :  { %1300 = shalt.err (!%p1297_p10)
}
  0x1c   :  { %s1301_s17 = scalar_lea.vmem %s62_s28, 6144  ;;  %p1306_p12 = scmp.lt.s32.totalorder %s62_s28, %s62_s28 }
  0x1d   :  { %p1302_p11 = scmp.ne.s32.totalorder %s62_s28, %s1301_s17  ;;  %p1307_p13 = scmp.lt.s32.totalorder %s1301_s17, %s1301_s17 }
  0x1f   :  { %p1308_p0 = por %p1307_p13, %p1306_p12 }
  0x21   :  { %p1309_p1 = pnand %p1308_p0, %p1302_p11 }
  0x23   :  { %1312 = shalt.err (!%p1309_p1)
}
  0x24   :  { %s1437_s1 = smov 128   ;;  %s1438_s14 = smov 8  }
  0x25   :  { %67 = dma.hbm_to_vmem [thread:$0]  %s1677_s4, 6144, %s62_s28, [#allocation9], %s1437_s1, %s1437_s1, %s1438_s14  }
  0x26   :  { %s1439_s20 = smov [#allocation2]   ;;  %s1440_s22 = smov [#allocation7]  }
  0x27   :  { %s26_s21 = sshll.u32 %s1439_s20, 4  ;;  %s47_s25 = sshll.u32 %s1440_s22, 4  ;;  %s27_s21 = int_to_ptr.vmem [resolvable:$true] %s26_s21  ;;  %s1532_s25 = int_to_ptr.vmem [resolvable:$true] %s47_s25 }
  0x28   :  { %s1313_s29 = scalar_lea.hbm %s1673_s0, 128 }
  0x29   :  { %p1314_p2 = scmp.ne.s32.totalorder %s1673_s0, %s1313_s29  ;;  %p1317_p3 = scmp.lt.u32.totalorder %s1313_s29, %s1673_s0 }
  0x2b   :  { %p1319_p4 = pnand %p1317_p3, %p1314_p2 }
  0x2d   :  { %1322 = shalt.err (!%p1319_p4)
}
  0x2e   :  { %s1323_s4 = scalar_lea.vmem %s27_s21, 128  ;;  %p1328_p6 = scmp.lt.s32.totalorder %s27_s21, %s27_s21 }
  0x2f   :  { %p1324_p5 = scmp.ne.s32.totalorder %s27_s21, %s1323_s4  ;;  %p1329_p7 = scmp.lt.s32.totalorder %s1323_s4, %s1323_s4 }
  0x31   :  { %p1330_p8 = por %p1329_p7, %p1328_p6 }
  0x33   :  { %p1331_p9 = pnand %p1330_p8, %p1324_p5 }
  0x35   :  { %1334 = shalt.err (!%p1331_p9)
}
  0x36   :  { %29 = dma.hbm_to_vmem [thread:$0]  %s1673_s0, 128, %s27_s21, [#allocation3]  }
  0x37   :  { %s1335_s18 = scalar_lea.hbm %s1675_s2, 2304 }
  0x38   :  { %p1336_p10 = scmp.ne.s32.totalorder %s1675_s2, %s1335_s18  ;;  %p1339_p11 = scmp.lt.u32.totalorder %s1335_s18, %s1675_s2 }
  0x3a   :  { %p1341_p12 = pnand %p1339_p11, %p1336_p10 }
  0x3c   :  { %1344 = shalt.err (!%p1341_p12)
}
  0x3d   :  { %s1345_s27 = scalar_lea.vmem %s1532_s25, 2304  ;;  %p1350_p0 = scmp.lt.s32.totalorder %s1532_s25, %s1532_s25 }
  0x3e   :  { %p1346_p13 = scmp.ne.s32.totalorder %s1532_s25, %s1345_s27  ;;  %p1351_p1 = scmp.lt.s32.totalorder %s1345_s27, %s1345_s27 }
  0x40   :  { %p1352_p2 = por %p1351_p1, %p1350_p0 }
  0x42   :  { %p1353_p3 = pnand %p1352_p2, %p1346_p13 }
  0x44   :  { %1356 = shalt.err (!%p1353_p3)
}
  0x45   :  { %53 = dma.hbm_to_vmem [thread:$0]  %s1675_s2, 2304, %s1532_s25, [#allocation6], %s1434_s23, %s1434_s23, %s1435_s24  }
  0x46   :  { %s1441_s29 = smov [#allocation10]   ;;  %s1442_s11 = smov [#allocation11]  }
  0x47   :  { %s75_s30 = sshll.u32 %s1441_s29, 4  ;;  %s89_s12 = sshll.u32 %s1442_s11, 4  ;;  %s76_s30 = int_to_ptr.vmem [resolvable:$true] %s75_s30  ;;  %s1566_s12 = int_to_ptr.vmem [resolvable:$true] %s89_s12 }
  0x48   :  { %s1357_s28 = scalar_lea.hbm %s1679_s6, 2048 }
  0x49   :  { %p1358_p4 = scmp.ne.s32.totalorder %s1679_s6, %s1357_s28  ;;  %p1361_p5 = scmp.lt.u32.totalorder %s1357_s28, %s1679_s6 }
  0x4b   :  { %p1363_p6 = pnand %p1361_p5, %p1358_p4 }
  0x4d   :  { %1366 = shalt.err (!%p1363_p6)
}
  0x4e   :  { %s1367_s2 = scalar_lea.vmem %s76_s30, 2048  ;;  %p1372_p8 = scmp.lt.s32.totalorder %s76_s30, %s76_s30 }
  0x4f   :  { %p1368_p7 = scmp.ne.s32.totalorder %s76_s30, %s1367_s2  ;;  %p1373_p9 = scmp.lt.s32.totalorder %s1367_s2, %s1367_s2 }
  0x51   :  { %p1374_p10 = por %p1373_p9, %p1372_p8 }
  0x53   :  { %p1375_p11 = pnand %p1374_p10, %p1368_p7 }
  0x55   :  { %1378 = shalt.err (!%p1375_p11)
}
  0x56   :  { %81 = dma.hbm_to_vmem [thread:$0]  %s1679_s6, 2048, %s76_s30, [#allocation9], %s1437_s1, %s1437_s1, %s1438_s14  }
  0x57   :  { %s1379_s20 = scalar_lea.hbm %s1681_s8, 2048 }
  0x58   :  { %p1380_p12 = scmp.ne.s32.totalorder %s1681_s8, %s1379_s20  ;;  %p1383_p13 = scmp.lt.u32.totalorder %s1379_s20, %s1681_s8 }
  0x5a   :  { %p1385_p0 = pnand %p1383_p13, %p1380_p12 }
  0x5c   :  { %1388 = shalt.err (!%p1385_p0)
}
  0x5d   :  { %s1389_s21 = scalar_lea.vmem %s1566_s12, 2048  ;;  %p1394_p2 = scmp.lt.s32.totalorder %s1566_s12, %s1566_s12 }
  0x5e   :  { %p1390_p1 = scmp.ne.s32.totalorder %s1566_s12, %s1389_s21  ;;  %p1395_p3 = scmp.lt.s32.totalorder %s1389_s21, %s1389_s21 }
  0x60   :  { %p1396_p4 = por %p1395_p3, %p1394_p2 }
  0x62   :  { %p1397_p5 = pnand %p1396_p4, %p1390_p1 }
  0x64   :  { %1400 = shalt.err (!%p1397_p5)
}
  0x65   :  { %95 = dma.hbm_to_vmem [thread:$0]  %s1681_s8, 2048, %s1566_s12, [#allocation12], %s1437_s1, %s1437_s1, %s1438_s14  }
  0x66   :  { %1423 = dma.done.wait [#allocation3], 128  }
  0x67   :  { %1424 = vsyncadd [#allocation3], 4294967168 }
  0x68   :  { %1425 = dma.done.wait [#allocation6], 4608  }
  0x69   :  { %1426 = vsyncadd [#allocation6], 4294962688 }
  0x6a   :  { %1427 = dma.done.wait [#allocation9], 8192  }
  0x6b   :  { %1428 = vsyncadd [#allocation9], 4294959104 }
  0x6c   :  { %1429 = dma.done.wait [#allocation12], 2048  }
  0x6d   :  { %1430 = vsyncadd [#allocation12], 4294965248  ;;  %v1443_v0 = vmov 0.0|0.0   ;;  %v1444_v1 = vmov 0.0   ;;  %vm1445_vm0 = vmmov 0   ;;  %v118_v2 = vld [vmem:[#allocation5 + $0x8] sm:$0xff] }
  0x6e   :  { %1121 = vmatprep.subr.bf16.mxu1 %v1443_v0  ;;  %203 = vmatprep.mubr.f32.mxu0 %v1444_v1  ;;  %v121_v3 = vld [vmem:[#allocation5 + $0x20] sm:$0xff]  ;;  %v119_v4 = vld [vmem:[#allocation5 + $0x10] sm:$0xff]  ;;  %v122_v6 = vld [vmem:[#allocation5 + $0x28] sm:$0xff]  ;;  %vm135_vm1 = vcmask 392192   ;;  %s1446_s13 = smov [#allocation13]  }
  0x6f   :  { %986 = vmatprep.mubr.msk.f32.mxu1 %vm1445_vm0, %v1444_v1  ;;  %v1109_v5 = vpack.c.bf16 %v121_v3, %v118_v2  ;;  %v117_v7 = vld [vmem:[#allocation5] sm:$0xff]  ;;  %v120_v8 = vld [vmem:[#allocation5 + $0x18] sm:$0xff]  ;;  %v1122_v9 = vpack.c.bf16 %v122_v6, %v119_v4  ;;  %v127_v12 = vld [vmem:[#allocation5 + $0x50] sm:$0xff]  ;;  %s855_s4 = sshll.u32 %s1446_s13, 4  ;;  %s856_s4 = int_to_ptr.vmem [resolvable:$true] %s855_s4 }
  0x70   :  { %v1111_v10 = vpack.c.bf16 %v120_v8, %v117_v7  ;;  %v124_v11 = vld [vmem:[#allocation5 + $0x38] sm:$0xff]  ;;  %v125_v13 = vld [vmem:[#allocation5 + $0x40] sm:$0xff]  ;;  %v123_v16 = vld [vmem:[#allocation5 + $0x30] sm:$0xff]  ;;  %s1401_s28 = scalar_lea.vmem %s856_s4, 128  ;;  %p1406_p7 = scmp.lt.s32.totalorder %s856_s4, %s856_s4 }
  0x71   :  { %1110 = vmatprep.subr.bf16.mxu0 %v1109_v5  ;;  %v1113_v14 = vpack.c.bf16 %v127_v12, %v124_v11  ;;  %v128_v15 = vld [vmem:[#allocation5 + $0x58] sm:$0xff]  ;;  %v126_v17 = vld [vmem:[#allocation5 + $0x48] sm:$0xff]  ;;  %1123 = vmatpush3.bf16.msra.mxu1 %v1122_v9  ;;  %v133_v21 = vld [vmem:[#allocation5 + $0x80] sm:$0xff]  ;;  %p1402_p6 = scmp.ne.s32.totalorder %s856_s4, %s1401_s28  ;;  %p1407_p8 = scmp.lt.s32.totalorder %s1401_s28, %s1401_s28 }
  0x72   :  { %1112 = vmatpush1.bf16.msra.mxu0 %v1111_v10  ;;  %v1125_v18 = vpack.c.bf16 %v128_v15, %v125_v13  ;;  %v1115_v19 = vpack.c.bf16 %v126_v17, %v123_v16  ;;  %v130_v20 = vld [vmem:[#allocation5 + $0x68] sm:$0xff]  ;;  %v131_v22 = vld [vmem:[#allocation5 + $0x70] sm:$0xff]  ;;  %1124 = vmatprep.subr.bf16.mxu1 %v1443_v0  ;;  %v129_v25 = vld [vmem:[#allocation5 + $0x60] sm:$0xff] }
  0x73   :  { %1114 = vmatprep.subr.bf16.mxu0 %v1113_v14  ;;  %v1117_v23 = vpack.c.bf16 %v133_v21, %v130_v20  ;;  %v134_v24 = vld [vmem:[#allocation5 + $0x88] sm:$0xff]  ;;  %v132_v26 = vld [vmem:[#allocation5 + $0x78] sm:$0xff]  ;;  %v284_v28 = vld [vmem:[#allocation7 + $0x20] sm:$0xff]  ;;  %p1408_p9 = por %p1407_p8, %p1406_p7 }
  0x74   :  { %v281_v27 = vld [vmem:[#allocation7 + $0x8] sm:$0xff]  ;;  %v1128_v29 = vpack.c.bf16 %v134_v24, %v131_v22  ;;  %v1119_v30 = vpack.c.bf16 %v132_v26, %v129_v25  ;;  %v282_v31 = vld [vmem:[#allocation7 + $0x10] sm:$0xff]  ;;  %v280_v34 = vld [vmem:[#allocation7] sm:$0xff] }
  0x75   :  { %1126 = vmatpush3.bf16.msra.mxu1 %v1125_v18  ;;  %v1130_v32 = vpack.c.bf16 %v284_v28, %v281_v27  ;;  %v285_v33 = vld [vmem:[#allocation7 + $0x28] sm:$0xff]  ;;  %v283_v35 = vld [vmem:[#allocation7 + $0x18] sm:$0xff]  ;;  %v290_v37 = vld [vmem:[#allocation7 + $0x50] sm:$0xff]  ;;  %p1409_p10 = pnand %p1408_p9, %p1402_p6 }
  0x76   :  { %1116 = vmatpush1.bf16.msra.mxu0 %v1115_v19  ;;  %1127 = vmatprep.subr.bf16.mxu1 %v1443_v0  ;;  %v287_v36 = vld [vmem:[#allocation7 + $0x38] sm:$0xff]  ;;  %v116_v38 = vld [vmem:[#allocation2] sm:$0xff]  ;;  %v1143_v39 = vpack.c.bf16 %v285_v33, %v282_v31  ;;  %v1132_v40 = vpack.c.bf16 %v283_v35, %v280_v34  ;;  %v288_v41 = vld [vmem:[#allocation7 + $0x40] sm:$0xff] }
  0x77   :  { %1118 = vmatprep.subr.bf16.mxu0 %v1117_v23  ;;  %v1134_v42 = vpack.c.bf16 %v290_v37, %v287_v36  ;;  %v291_v43 = vld [vmem:[#allocation7 + $0x58] sm:$0xff]  ;;  %v286_v44 = vld [vmem:[#allocation7 + $0x30] sm:$0xff]  ;;  %v289_v45 = vld [vmem:[#allocation7 + $0x48] sm:$0xff] }
  0x78   :  { %v293_v46 = vld [vmem:[#allocation7 + $0x68] sm:$0xff]  ;;  %v296_v47 = vld [vmem:[#allocation7 + $0x80] sm:$0xff]  ;;  %v1146_v48 = vpack.c.bf16 %v291_v43, %v288_v41  ;;  %v1136_v49 = vpack.c.bf16 %v289_v45, %v286_v44  ;;  %v294_v50 = vld [vmem:[#allocation7 + $0x70] sm:$0xff] }
  0x79   :  { %1129 = vmatpush3.bf16.msra.mxu1 %v1128_v29  ;;  %v1138_v51 = vpack.c.bf16 %v296_v47, %v293_v46  ;;  %v297_v52 = vld [vmem:[#allocation7 + $0x88] sm:$0xff]  ;;  %v292_v53 = vld [vmem:[#allocation7 + $0x60] sm:$0xff]  ;;  %v295_v54 = vld [vmem:[#allocation7 + $0x78] sm:$0xff] }
  0x7a   :  { %1120 = vmatpush1.bf16.msra.mxu0 %v1119_v30  ;;  %1142 = vmatprep.subr.bf16.mxu1 %v1443_v0  ;;  %v481_v55 = vld [vmem:[#allocation8 + $0x80] sm:$0xff]  ;;  %v482_v56 = vld [vmem:[#allocation8 + $0x88] sm:$0xff]  ;;  %v1149_v57 = vpack.c.bf16 %v297_v52, %v294_v50  ;;  %v1140_v58 = vpack.c.bf16 %v295_v54, %v292_v53  ;;  %v483_v2 = vld [vmem:[#allocation8 + $0x90] sm:$0xff] }
  0x7b   :  { %1131 = vmatprep.subr.bf16.mxu0 %v1130_v32  ;;  %v497_v59 = vld [vmem:[#allocation8 + $0x100] sm:$0xff]  ;;  %v498_v60 = vld [vmem:[#allocation8 + $0x108] sm:$0xff]  ;;  %v1151_v61 = vpack.c.bf16 %v482_v56, %v481_v55  ;;  %v484_v3 = vld [vmem:[#allocation8 + $0x98] sm:$0xff] }
  0x7c   :  { %987 = vmatmul.mubr.msk.f32.vlgmr.msra.gmra.mrb[0].mxu1 %vm135_vm1, %v116_v38  ;;  %v465_v62 = vld [vmem:[#allocation8] sm:$0xff]  ;;  %v466_v63 = vld [vmem:[#allocation8 + $0x8] sm:$0xff]  ;;  %v1184_v4 = vpack.c.bf16 %v498_v60, %v497_v59  ;;  %v499_v6 = vld [vmem:[#allocation8 + $0x110] sm:$0xff]  ;;  %v1155_v8 = vpack.c.bf16 %v484_v3, %v483_v2 }
  0x7d   :  { %867 = vmatmul.mubr.msk.f32.vlgmr.msra.gmra.mrb[0].mxu0 %vm135_vm1, %v116_v38  ;;  %1144 = vmatpush3.bf16.msra.mxu1 %v1143_v39  ;;  %v1153_v5 = vpack.c.bf16 %v466_v63, %v465_v62  ;;  %v500_v7 = vld [vmem:[#allocation8 + $0x118] sm:$0xff]  ;;  %v467_v9 = vld [vmem:[#allocation8 + $0x10] sm:$0xff]  ;;  %v485_v11 = vld [vmem:[#allocation8 + $0xa0] sm:$0xff] }
  0x7e   :  { %1133 = vmatpush1.bf16.msra.mxu0 %v1132_v40  ;;  %1145 = vmatprep.subr.bf16.mxu1 %v1443_v0  ;;  %v468_v10 = vld [vmem:[#allocation8 + $0x18] sm:$0xff]  ;;  %v486_v12 = vld [vmem:[#allocation8 + $0xa8] sm:$0xff]  ;;  %v1187_v13 = vpack.c.bf16 %v500_v7, %v499_v6  ;;  %v501_v15 = vld [vmem:[#allocation8 + $0x120] sm:$0xff] }
  0x7f   :  { %1135 = vmatprep.subr.bf16.mxu0 %v1134_v42  ;;  %1001 = vmatprep.mubr.msk.f32.mxu1 %vm1445_vm0, %v1444_v1  ;;  %v1157_v14 = vpack.c.bf16 %v468_v10, %v467_v9  ;;  %v502_v16 = vld [vmem:[#allocation8 + $0x128] sm:$0xff]  ;;  %v1159_v17 = vpack.c.bf16 %v486_v12, %v485_v11  ;;  %v469_v18 = vld [vmem:[#allocation8 + $0x20] sm:$0xff]  ;;  %v503_v22 = vld [vmem:[#allocation8 + $0x130] sm:$0xff] }
  0x80   :  { %362 = vmatprep.mubr.f32.mxu0 %v1444_v1  ;;  %v470_v19 = vld [vmem:[#allocation8 + $0x28] sm:$0xff]  ;;  %v1190_v20 = vpack.c.bf16 %v502_v16, %v501_v15  ;;  %v504_v23 = vld [vmem:[#allocation8 + $0x138] sm:$0xff]  ;;  %v487_v25 = vld [vmem:[#allocation8 + $0xb0] sm:$0xff] }
  0x81   :  { %1147 = vmatpush3.bf16.msra.mxu1 %v1146_v48  ;;  %v1161_v21 = vpack.c.bf16 %v470_v19, %v469_v18  ;;  %v1193_v24 = vpack.c.bf16 %v504_v23, %v503_v22  ;;  %v488_v26 = vld [vmem:[#allocation8 + $0xb8] sm:$0xff]  ;;  %v471_v28 = vld [vmem:[#allocation8 + $0x30] sm:$0xff]  ;;  %v505_v31 = vld [vmem:[#allocation8 + $0x140] sm:$0xff] }
  0x82   :  { %1137 = vmatpush1.bf16.msra.mxu0 %v1136_v49  ;;  %1148 = vmatprep.subr.bf16.mxu1 %v1443_v0  ;;  %v1163_v27 = vpack.c.bf16 %v488_v26, %v487_v25  ;;  %v472_v29 = vld [vmem:[#allocation8 + $0x38] sm:$0xff]  ;;  %v506_v32 = vld [vmem:[#allocation8 + $0x148] sm:$0xff]  ;;  %v489_v33 = vld [vmem:[#allocation8 + $0xc0] sm:$0xff] }
  0x83   :  { %1139 = vmatprep.subr.bf16.mxu0 %v1138_v51  ;;  %v1165_v30 = vpack.c.bf16 %v472_v29, %v471_v28  ;;  %v1196_v34 = vpack.c.bf16 %v506_v32, %v505_v31  ;;  %v490_v35 = vld [vmem:[#allocation8 + $0xc8] sm:$0xff]  ;;  %v473_v36 = vld [vmem:[#allocation8 + $0x40] sm:$0xff]  ;;  %v507_v40 = vld [vmem:[#allocation8 + $0x150] sm:$0xff] }
  0x84   :  { %v474_v37 = vld [vmem:[#allocation8 + $0x48] sm:$0xff]  ;;  %v508_v41 = vld [vmem:[#allocation8 + $0x158] sm:$0xff]  ;;  %v491_v42 = vld [vmem:[#allocation8 + $0xd0] sm:$0xff] }
  0x85   :  { %1150 = vmatpush3.bf16.msra.mxu1 %v1149_v57  ;;  %v1169_v39 = vpack.c.bf16 %v474_v37, %v473_v36  ;;  %v1199_v43 = vpack.c.bf16 %v508_v41, %v507_v40  ;;  %v492_v44 = vld [vmem:[#allocation8 + $0xd8] sm:$0xff]  ;;  %v475_v45 = vld [vmem:[#allocation8 + $0x50] sm:$0xff]  ;;  %v509_v49 = vld [vmem:[#allocation8 + $0x160] sm:$0xff] }
  0x86   :  { %1141 = vmatpush1.bf16.msra.mxu0 %v1140_v58  ;;  %1183 = vmatprep.subr.bf16.mxu1 %v1443_v0  ;;  %v476_v46 = vld [vmem:[#allocation8 + $0x58] sm:$0xff]  ;;  %v1171_v47 = vpack.c.bf16 %v492_v44, %v491_v42  ;;  %v510_v50 = vld [vmem:[#allocation8 + $0x168] sm:$0xff]  ;;  %v493_v52 = vld [vmem:[#allocation8 + $0xe0] sm:$0xff] }
  0x87   :  { %1152 = vmatprep.subr.bf16.mxu0 %v1151_v61  ;;  %v1173_v48 = vpack.c.bf16 %v476_v46, %v475_v45  ;;  %v1202_v51 = vpack.c.bf16 %v510_v50, %v509_v49  ;;  %v494_v53 = vld [vmem:[#allocation8 + $0xe8] sm:$0xff]  ;;  %v477_v55 = vld [vmem:[#allocation8 + $0x60] sm:$0xff]  ;;  %v511_v58 = vld [vmem:[#allocation8 + $0x170] sm:$0xff] }
  0x88   :  { %1002 = vmatmul.mubr.msk.f32.vlgmr.msra.gmra.mrb[2].mxu1 %vm135_vm1, %v116_v38  ;;  %v1175_v54 = vpack.c.bf16 %v494_v53, %v493_v52  ;;  %v478_v56 = vld [vmem:[#allocation8 + $0x68] sm:$0xff]  ;;  %v512_v59 = vld [vmem:[#allocation8 + $0x178] sm:$0xff]  ;;  %v495_v61 = vld [vmem:[#allocation8 + $0xf0] sm:$0xff] }
  0x89   :  { %869 = vmatmul.mubr.msk.f32.vlgmr.msra.gmra.mrb[2].mxu0 %vm135_vm1, %v116_v38  ;;  %1185 = vmatpush3.bf16.msra.mxu1 %v1184_v4  ;;  %v1167_v38 = vpack.c.bf16 %v490_v35, %v489_v33  ;;  %v1177_v57 = vpack.c.bf16 %v478_v56, %v477_v55  ;;  %v1205_v60 = vpack.c.bf16 %v512_v59, %v511_v58  ;;  %v496_v62 = vld [vmem:[#allocation8 + $0xf8] sm:$0xff]  ;;  %v479_v2 = vld [vmem:[#allocation8 + $0x70] sm:$0xff]  ;;  %v662_v28 = vld [vmem:[#allocation10 + $0x8] sm:$0xff] }
  0x8a   :  { %1154 = vmatpush3.bf16.msra.mxu0 %v1153_v5  ;;  %1186 = vmatprep.subr.bf16.mxu1 %v1443_v0  ;;  %v1179_v63 = vpack.c.bf16 %v496_v62, %v495_v61  ;;  %v480_v3 = vld [vmem:[#allocation8 + $0x78] sm:$0xff]  ;;  %v444_v5 = vlaneseq  ;;  %v665_v37 = vld [vmem:[#allocation10 + $0x20] sm:$0xff]  ;;  %v667_v40 = vld [vmem:[#allocation10 + $0x30] sm:$0xff] }
  0x8b   :  { %1156 = vmatprep.subr.bf16.mxu0 %v1155_v8  ;;  %1036 = vmatprep.mubr.msk.f32.mxu1 %vm1445_vm0, %v1444_v1  ;;  %v1181_v4 = vpack.c.bf16 %v480_v3, %v479_v2  ;;  %v664_v35 = vld [vmem:[#allocation10 + $0x18] sm:$0xff]  ;;  %v670_v44 = vld [vmem:[#allocation10 + $0x48] sm:$0xff]  ;;  %v757_v56 = vld [vmem:[#allocation11 + $0x10] sm:$0xff] }
  0x8c   :  { %v445_v10 = vshrl.u32 %v444_v5, 7  ;;  %v668_v41 = vld [vmem:[#allocation10 + $0x38] sm:$0xff]  ;;  %v674_v49 = vld [vmem:[#allocation10 + $0x68] sm:$0xff] }
  0x8d   :  { %1188 = vmatpush3.bf16.msra.mxu1 %v1187_v13  ;;  %v442_v13 = vld [vmem:[%s1676_s3] sm:$0x7]  ;;  %v1217_v42 = vpack.c.bf16 %v668_v41, %v667_v40  ;;  %v756_v55 = vld [vmem:[#allocation11 + $0x8] sm:$0xff] }
  0x8e   :  { %1158 = vmatpush3.bf16.msra.mxu0 %v1157_v14  ;;  %1189 = vmatprep.subr.bf16.mxu1 %v1443_v0  ;;  %v454_v11 = vsub.s32 2, %v445_v10  ;;  %v446_v12 = vsub.s32 0, %v445_v10  ;;  %v450_v14 = vsub.s32 1, %v445_v10  ;;  %v672_v46 = vld [vmem:[#allocation10 + $0x58] sm:$0xff]  ;;  %v760_v61 = vld [vmem:[#allocation11 + $0x28] sm:$0xff]  ;;  %v767_v10 = vld [vmem:[#allocation11 + $0x60] sm:$0xff] }
  0x8f   :  { %1160 = vmatprep.subr.bf16.mxu0 %v1159_v17  ;;  %v676_v52 = vld [vmem:[#allocation10 + $0x78] sm:$0xff]  ;;  %v764_v5 = vld [vmem:[#allocation11 + $0x48] sm:$0xff] }
  0x90   :  { %v455_v15 = vrot.slane %v442_v13, %v454_v11  ;;  %v447_v16 = vrot.slane %v442_v13, %v446_v12  ;;  %v451_v19 = vrot.slane %v442_v13, %v450_v14  ;;  %v758_v58 = vld [vmem:[#allocation11 + $0x18] sm:$0xff]  ;;  %v768_v11 = vld [vmem:[#allocation11 + $0x68] sm:$0xff] }
  0x91   :  { %1191 = vmatpush3.bf16.msra.mxu1 %v1190_v20  ;;  %v1235_v59 = vpack.c.bf16 %v758_v58, %v757_v56  ;;  %v762_v2 = vld [vmem:[#allocation11 + $0x38] sm:$0xff]  ;;  %v1250_v12 = vpack.c.bf16 %v768_v11, %v767_v10 }
  0x92   :  { %1162 = vmatpush3.bf16.msra.mxu0 %v1161_v21  ;;  %1192 = vmatprep.subr.bf16.mxu1 %v1443_v0 }
  0x93   :  { %1164 = vmatprep.subr.bf16.mxu0 %v1163_v27  ;;  %v661_v27 = vld [vmem:[#allocation10] sm:$0xff] }
  0x94   :  { %v1208_v32 = vpack.c.bf16 %v662_v28, %v661_v27 }
  0x95   :  { %1194 = vmatpush3.bf16.msra.mxu1 %v1193_v24 }
  0x96   :  { %1195 = vmatprep.subr.bf16.mxu1 %v1443_v0  ;;  %1166 = vmatpush3.bf16.msra.mxu0 %v1165_v30 }
  0x97   :  { %1168 = vmatprep.subr.bf16.mxu0 %v1167_v38  ;;  %v666_v38 = vld [vmem:[#allocation10 + $0x28] sm:$0xff] }
  0x99   :  { %1197 = vmatpush3.bf16.msra.mxu1 %v1196_v34  ;;  %v663_v34 = vld [vmem:[#allocation10 + $0x10] sm:$0xff] }
  0x9a   :  { %1198 = vmatprep.subr.bf16.mxu1 %v1443_v0  ;;  %1170 = vmatpush3.bf16.msra.mxu0 %v1169_v39  ;;  %v1211_v36 = vpack.c.bf16 %v664_v35, %v663_v34  ;;  %v1214_v39 = vpack.c.bf16 %v666_v38, %v665_v37 }
  0x9b   :  { %1172 = vmatprep.subr.bf16.mxu0 %v1171_v47 }
  0x9d   :  { %1200 = vmatpush3.bf16.msra.mxu1 %v1199_v43  ;;  %v669_v43 = vld [vmem:[#allocation10 + $0x40] sm:$0xff] }
  0x9e   :  { %1201 = vmatprep.subr.bf16.mxu1 %v1443_v0  ;;  %1174 = vmatpush3.bf16.msra.mxu0 %v1173_v48  ;;  %v1220_v45 = vpack.c.bf16 %v670_v44, %v669_v43  ;;  %v673_v48 = vld [vmem:[#allocation10 + $0x60] sm:$0xff] }
  0x9f   :  { %1176 = vmatprep.subr.bf16.mxu0 %v1175_v54  ;;  %v1226_v50 = vpack.c.bf16 %v674_v49, %v673_v48  ;;  %v755_v54 = vld [vmem:[#allocation11] sm:$0xff] }
  0xa1   :  { %1203 = vmatpush3.bf16.msra.mxu1 %v1202_v51  ;;  %v675_v51 = vld [vmem:[#allocation10 + $0x70] sm:$0xff] }
  0xa2   :  { %1204 = vmatprep.subr.bf16.mxu1 %v1443_v0  ;;  %1178 = vmatpush3.bf16.msra.mxu0 %v1177_v57  ;;  %v1229_v53 = vpack.c.bf16 %v676_v52, %v675_v51  ;;  %v1232_v57 = vpack.c.bf16 %v756_v55, %v755_v54 }
  0xa3   :  { %1180 = vmatprep.subr.bf16.mxu0 %v1179_v63  ;;  %v761_v63 = vld [vmem:[#allocation11 + $0x30] sm:$0xff] }
  0xa4   :  { %v1241_v3 = vpack.c.bf16 %v762_v2, %v761_v63 }
  0xa5   :  { %1206 = vmatpush3.bf16.msra.mxu1 %v1205_v60  ;;  %v759_v60 = vld [vmem:[#allocation11 + $0x20] sm:$0xff] }
  0xa6   :  { %1231 = vmatprep.subr.bf16.mxu1 %v1443_v0  ;;  %1182 = vmatpush3.bf16.msra.mxu0 %v1181_v4  ;;  %v1238_v62 = vpack.c.bf16 %v760_v61, %v759_v60  ;;  %v763_v4 = vld [vmem:[#allocation11 + $0x40] sm:$0xff] }
  0xa7   :  { %1207 = vmatprep.subr.bf16.mxu0 %v1443_v0 }
 0x14f   :  { %v276_v7 = vpop.f32.mrb[0].mxu1 }
 0x150   :  { %v205_v6 = vpop.f32.mrb[0].mxu0  ;;  %v988_v9 = vpop.f32.mrb[1].mxu1 }
 0x151   :  { %v207_v8 = vpop.f32.mrb[1].mxu0 }
 0x15b   :  { %v435_v17 = vpop.f32.mrb[2].mxu1 }
 0x15c   :  { %v364_v18 = vpop.f32.mrb[2].mxu0  ;;  %v441_v20 = vmax.f32 %v276_v7, %v435_v17  ;;  %v1003_v23 = vpop.f32.mrb[3].mxu1  ;;  %v765_v7 = vld [vmem:[#allocation11 + $0x50] sm:$0xff] }
 0x15d   :  { %v439_v21 = vmax.f32 %v205_v6, %v364_v18  ;;  %v366_v22 = vpop.f32.mrb[3].mxu0  ;;  %v1244_v6 = vpack.c.bf16 %v764_v5, %v763_v4  ;;  %v770_v23 = vld [vmem:[#allocation11 + $0x78] sm:$0xff] }
 0x15e   :  { %v440_v24 = vmax.f32 %v207_v8, %v366_v22  ;;  %v461_v25 = vadd.f32 %v455_v15, %v441_v20  ;;  %v766_v8 = vld [vmem:[#allocation11 + $0x58] sm:$0xff]  ;;  %v769_v22 = vld [vmem:[#allocation11 + $0x70] sm:$0xff] }
 0x15f   :  { %v459_v26 = vadd.f32 %v447_v16, %v439_v21  ;;  %v1247_v9 = vpack.c.bf16 %v766_v8, %v765_v7  ;;  %v871_v16 = vld [vmem:[%s1678_s5] ss:$0 sm:$0xff] }
 0x160   :  { %v460_v29 = vadd.f32 %v451_v19, %v440_v24  ;;  %v464_v30 = vmax.f32 %v461_v25, 0.0  ;;  %v1253_v24 = vpack.c.bf16 %v770_v23, %v769_v22 }
 0x161   :  { %v462_v33 = vmax.f32 %v459_v26, 0.0 }
 0x162   :  { %v463_v31 = vmax.f32 %v460_v29, 0.0  ;;  %1037 = vmatmul.mubr.f32.vlgmr.msra.gmra.mrb[4].mxu1 %v464_v30  ;;  %v873_v29 = vld [vmem:[%s1682_s9] ss:$0 sm:$0xff] }
 0x163   :  { %1106 = vmatprep.mubr.msk.f32.mxu1 %vm1445_vm0, %v1444_v1  ;;  %1233 = vmatpush3.bf16.msra.mxu1 %v1232_v57 }
 0x164   :  { %584 = vmatprep.mubr.f32.mxu0 %v463_v31  ;;  %1234 = vmatprep.subr.bf16.mxu1 %v1443_v0 }
 0x165   :  { %585 = vmatmul.mubr.f32.vlgmr.msra.gmra.mrb[4].mxu0 %v462_v33 }
 0x166   :  { %1209 = vmatpush3.bf16.msra.mxu0 %v1208_v32  ;;  %1071 = vmatprep.mubr.msk.f32.mxu0 %vm1445_vm0, %v1444_v1  ;;  %v671_v1 = vld [vmem:[#allocation10 + $0x50] sm:$0xff] }
 0x167   :  { %1210 = vmatprep.subr.bf16.mxu0 %v1443_v0  ;;  %v1223_v47 = vpack.c.bf16 %v672_v46, %v671_v1  ;;  %1236 = vmatpush3.bf16.msra.mxu1 %v1235_v59 }
 0x168   :  { %1237 = vmatprep.subr.bf16.mxu1 %v1443_v0 }
 0x16a   :  { %1212 = vmatpush3.bf16.msra.mxu0 %v1211_v36 }
 0x16b   :  { %1213 = vmatprep.subr.bf16.mxu0 %v1443_v0  ;;  %1239 = vmatpush3.bf16.msra.mxu1 %v1238_v62 }
 0x16c   :  { %1240 = vmatprep.subr.bf16.mxu1 %v1443_v0 }
 0x16e   :  { %1215 = vmatpush3.bf16.msra.mxu0 %v1214_v39 }
 0x16f   :  { %1216 = vmatprep.subr.bf16.mxu0 %v1443_v0  ;;  %1242 = vmatpush3.bf16.msra.mxu1 %v1241_v3 }
 0x170   :  { %1243 = vmatprep.subr.bf16.mxu1 %v1443_v0 }
 0x172   :  { %1218 = vmatpush3.bf16.msra.mxu0 %v1217_v42 }
 0x173   :  { %1219 = vmatprep.subr.bf16.mxu0 %v1443_v0  ;;  %1245 = vmatpush3.bf16.msra.mxu1 %v1244_v6 }
 0x174   :  { %1246 = vmatprep.subr.bf16.mxu1 %v1443_v0 }
 0x176   :  { %1221 = vmatpush3.bf16.msra.mxu0 %v1220_v45 }
 0x177   :  { %1222 = vmatprep.subr.bf16.mxu0 %v1443_v0  ;;  %1248 = vmatpush3.bf16.msra.mxu1 %v1247_v9 }
 0x178   :  { %1249 = vmatprep.subr.bf16.mxu1 %v1443_v0 }
 0x17a   :  { %1224 = vmatpush3.bf16.msra.mxu0 %v1223_v47 }
 0x17b   :  { %1225 = vmatprep.subr.bf16.mxu0 %v1443_v0  ;;  %1251 = vmatpush3.bf16.msra.mxu1 %v1250_v12 }
 0x17c   :  { %1252 = vmatprep.subr.bf16.mxu1 %v1443_v0 }
 0x17e   :  { %1227 = vmatpush3.bf16.msra.mxu0 %v1226_v50 }
 0x17f   :  { %1228 = vmatprep.subr.bf16.mxu0 %v1443_v0  ;;  %1254 = vmatpush3.bf16.msra.mxu1 %v1253_v24  ;;  %v872_v0 = vld [vmem:[%s1680_s7] ss:$0 sm:$0xff] }
 0x182   :  { %1230 = vmatpush3.bf16.msra.mxu0 %v1229_v53 }
 0x235   :  { %v656_v13 = vpop.f32.mrb[4].mxu1 }
 0x236   :  { %v1038_v14 = vpop.f32.mrb[5].mxu1 }
 0x238   :  { %v920_v15 = vpop.f32.mrb[4].mxu0 }
 0x239   :  { %v921_v17 = vpop.f32.mrb[5].mxu0 }
 0x23a   :  { %v922_v18 = vadd.f32 %v921_v17, %v920_v15 }
 0x23c   :  { %v587_v19 = vadd.f32 %v922_v18, %v871_v16 }
 0x23e   :  { %v657_v20 = vadd.f32 %v656_v13, %v587_v19 }
 0x240   :  { %v660_v21 = vmax.f32 %v657_v20, 0.0 }
 0x242   :  { %1072 = vmatmul.mubr.f32.vlgmr.msra.gmra.mrb[6].mxu0 %v660_v21 }
 0x315   :  { %v750_v25 = vpop.f32.mrb[6].mxu0 }
 0x316   :  { %v751_v26 = vadd.f32 %v872_v0, %v750_v25  ;;  %v1073_v27 = vpop.f32.mrb[7].mxu0 }
 0x318   :  { %v754_v28 = vmax.f32 %v751_v26, 0.0 }
 0x31a   :  { %1107 = vmatmul.mubr.f32.vlgmr.msra.gmra.mrb[6].mxu1 %v754_v28 }
 0x3ed   :  { %v844_v30 = vpop.f32.mrb[6].mxu1 }
 0x3ee   :  { %v845_v31 = vadd.f32 %v873_v29, %v844_v30  ;;  %v1108_v32 = vpop.f32.mrb[7].mxu1 }
 0x3f0   :  { %848 = vst [vmem:[#allocation13] sm:$0xff] %v845_v31 }
 0x3f1   :  { %1412 = shalt.err (!%p1409_p10)
}
 0x3f2   :  { %s1413_s16 = scalar_lea.hbm %s1683_s10, 128 }
 0x3f3   :  { %p1414_p11 = scmp.ne.s32.totalorder %s1683_s10, %s1413_s16  ;;  %p1417_p12 = scmp.lt.u32.totalorder %s1413_s16, %s1683_s10 }
 0x3f5   :  { %p1419_p13 = pnand %p1417_p12, %p1414_p11 }
 0x3f7   :  { %1422 = shalt.err (!%p1419_p13)
}
 0x3f8   :  { %858 = dma.vmem_to_hbm [thread:$0]  %s856_s4, 128, %s1683_s10, [#allocation4]  }
 0x3f9   :  { %1431 = dma.done.wait [#allocation4], 128  }
 0x3fa   :  { %1432 = vsyncadd [#allocation4], 4294967168 }
 0x3fb   :  { %862 = vsyncpa [#allocation3], 1 }
 0x3fc   :  { %863 = vsyncpa [#allocation6], 1 }
 0x3fd   :  { %864 = vsyncpa [#allocation9], 1 }
 0x3fe   :  { %865 = vsyncpa [#allocation12], 1 }
 0x3ff   :  { %866 = vsyncpa [#allocation4], 1 }

</bundles_post_ra>
